<compile_context>
chip_gen: v7x
topology: tpu7x:2x2x1
jax: 0.10.0
libtpu: 0.0.40
codegen_flags: <defaults>
</compile_context>

<pallas_src>
import functools

import jax
import jax.numpy as jnp
from jax.experimental import pallas as pl
from jax.experimental.pallas import tpu as pltpu

LANE = 128


def _round_up(x, m):
    return (x + m - 1) // m * m


def _detect_multi_tensorcore():
    """True on chips exposing >1 TensorCore per device (v4/v5p megacore, v7x)."""
    try:
        kind = jax.devices()[0].device_kind.lower()
    except Exception:
        return False
    return any(tag in kind for tag in ("v4", "v5p", "v7", "7x"))


def _make_autoencoder_kernel(n_layers, bottleneck_index, acts, with_z):
    """Kernel computing the full encoder+decoder stack on one batch tile.

    Closed-over args:
      n_layers:         total number of Linear layers.
      bottleneck_index: index of the layer whose output is the latent z.
      acts:             tuple of 'relu' / 'none' per layer.
      with_z:           whether a z output ref is present.
    """

    def kernel(*args):
        x_ref = args[0]
        param_refs = args[1 : 1 + 2 * n_layers]
        if with_z:
            z_ref, out_ref = args[1 + 2 * n_layers :]
        else:
            (out_ref,) = args[1 + 2 * n_layers :]

        h = x_ref[...]  # bf16 [TB, in_p]
        acc = None
        for i in range(n_layers):
            w = param_refs[2 * i][...]       # bf16 [in_p_i, out_p_i] (pre-transposed, padded)
            b = param_refs[2 * i + 1][...]   # f32  [1, out_p_i]
            acc = jnp.dot(h, w, preferred_element_type=jnp.float32) + b
            if acts[i] == "relu":
                acc = jnp.maximum(acc, 0.0)
            if with_z and i == bottleneck_index:
                z_ref[...] = acc.astype(z_ref.dtype)
            h = acc.astype(jnp.bfloat16)     # bf16 operand for next MXU pass
        out_ref[...] = acc.astype(out_ref.dtype)

    return kernel


class BaselineAutoencoderPallas:
    """JAX/Pallas equivalent of NetworkHandler.BaselineAutoencoder."""

    def __init__(self, input_dim, encoder_layers, encoder_bottleneck, decoder_layers,
                 key=jax.random.PRNGKey(0), batch_tile=512, out_dtype=jnp.bfloat16):
        # Layer dims: input -> encoder_layers... -> bottleneck -> decoder_layers...
        dims = [input_dim] + list(encoder_layers) + [encoder_bottleneck] + list(decoder_layers)
        self.dims = dims
        self.padded_dims = [_round_up(d, LANE) for d in dims]
        self.n_layers = len(dims) - 1
        self.bottleneck_index = len(encoder_layers)
        # Batch tile: 512 default (sweep 256-1024); rounded up to a lane multiple.
        self.batch_tile = _round_up(max(int(batch_tile), LANE), LANE)
        self.out_dtype = out_dtype
        self._multi_tc = _detect_multi_tensorcore()

        # Activations: ReLU on encoder hidden layers, none on bottleneck,
        # ReLU on decoder hidden layers, none on the final reconstruction layer.
        acts = []
        for i in range(self.n_layers):
            if i == self.bottleneck_index or i == self.n_layers - 1:
                acts.append("none")
            else:
                acts.append("relu")
        self.acts = tuple(acts)

        # Parameter init mimicking PyTorch nn.Linear default (+/- 1/sqrt(fan_in)).
        # Weights stored pre-transposed [in, out], cast to bf16 and zero-padded to
        # 128-lane multiples. Biases stay f32 [1, out_padded].
        # NOTE: bf16 weights/activations deviate from an f32 PyTorch baseline at
        # the ~1e-2 level; keep f32 weights if exact parity is required.
        self.params = []            # padded params fed to the kernel
        self.params_unpadded = []   # unpadded bf16/f32 params for the reference
        for i in range(self.n_layers):
            fan_in, fan_out = dims[i], dims[i + 1]
            in_p, out_p = self.padded_dims[i], self.padded_dims[i + 1]
            key, kw, kb = jax.random.split(key, 3)
            bound = 1.0 / jnp.sqrt(jnp.float32(fan_in))
            w = jax.random.uniform(kw, (fan_in, fan_out), jnp.float32, -bound, bound)
            b = jax.random.uniform(kb, (1, fan_out), jnp.float32, -bound, bound)
            w_bf16 = w.astype(jnp.bfloat16)
            w_pad = jnp.zeros((in_p, out_p), jnp.bfloat16).at[:fan_in, :fan_out].set(w_bf16)
            b_pad = jnp.zeros((1, out_p), jnp.float32).at[:, :fan_out].set(b)
            self.params.append((w_pad, b_pad))
            self.params_unpadded.append((w_bf16, b))

    # ---------------------------------------------------------------- helpers
    def _effective_tile(self, batch):
        """Pick the batch tile: big tiles to amortize overhead, but keep >=2 grid
        steps on multi-TensorCore chips so ("parallel",) can use both cores."""
        tb = min(self.batch_tile, _round_up(batch, LANE))
        if self._multi_tc and batch > LANE:
            half = (_round_up(batch, LANE) // 2) // LANE * LANE
            tb = min(tb, max(LANE, half))
        return max(tb, LANE)

    def _vmem_limit_bytes(self, tb, with_z):
        in_p = self.padded_dims[0]
        out_p = self.padded_dims[-1]
        z_p = self.padded_dims[self.bottleneck_index + 1]
        max_d = max(self.padded_dims)
        out_isz = jnp.dtype(self.out_dtype).itemsize
        # double-buffered activation blocks (bf16 in, out_dtype out/z)
        act = 2 * tb * in_p * 2 + 2 * tb * out_p * out_isz
        if with_z:
            act += 2 * tb * z_p * out_isz
        # resident weights/biases (constant index_map -> fetched once); allow the
        # compiler a second buffer anyway since this term is tiny here.
        par = sum(w.size * 2 + b.size * 4 for w, b in self.params) * 2
        # in-kernel temporaries: a few f32/bf16 copies of the widest activation
        tmp = 4 * tb * max_d * 4
        need = act + par + tmp
        # generous headroom for Mosaic internal scratch, no artificial 16 MiB floor;
        # clamp to 56 MiB so the request stays inside v7x's 64 MiB physical VMEM.
        limit = int(need * 1.5) + (8 << 20)
        return int(min(limit, 56 << 20))

    # ---------------------------------------------------------------- forward
    @functools.partial(jax.jit, static_argnums=(0,), static_argnames=("return_z",))
    def __call__(self, x, return_z=False):
        batch = x.shape[0]
        tb = self._effective_tile(batch)
        batch_p = _round_up(batch, tb)
        in_p = self.padded_dims[0]
        out_p = self.padded_dims[-1]
        z_p = self.padded_dims[self.bottleneck_index + 1]

        # Cast once to bf16; pad only when the shapes actually need it (a full
        # zero+set copy would be an extra HBM round-trip on a mem-bound kernel).
        x_p = x if x.dtype == jnp.bfloat16 else x.astype(jnp.bfloat16)
        pad_rows = batch_p - batch
        pad_cols = in_p - self.dims[0]
        if pad_rows or pad_cols:
            x_p = jnp.pad(x_p, ((0, pad_rows), (0, pad_cols)))

        flat_params = []
        for w, b in self.params:
            flat_params.extend([w, b])

        grid = (batch_p // tb,)

        x_spec = pl.BlockSpec((tb, in_p), lambda i: (i, 0))
        # Weights/biases: full-array blocks with a constant index_map -> fetched
        # once and kept resident in VMEM across all batch tiles.
        param_specs = [pl.BlockSpec(p.shape, lambda i: (0, 0)) for p in flat_params]
        out_spec = pl.BlockSpec((tb, out_p), lambda i: (i, 0))

        out_shape_p = jax.ShapeDtypeStruct((batch_p, out_p), self.out_dtype)

        kernel = _make_autoencoder_kernel(
            self.n_layers, self.bottleneck_index, self.acts, with_z=return_z
        )
        cparams = pltpu.CompilerParams(
            dimension_semantics=("parallel",),
            vmem_limit_bytes=self._vmem_limit_bytes(tb, return_z),
        )

        out_dim = self.dims[-1]
        z_dim = self.dims[self.bottleneck_index + 1]

        if return_z:
            z_shape_p = jax.ShapeDtypeStruct((batch_p, z_p), self.out_dtype)
            z_spec = pl.BlockSpec((tb, z_p), lambda i: (i, 0))
            z_pad, out_pad = pl.pallas_call(
                kernel,
                out_shape=(z_shape_p, out_shape_p),
                grid=grid,
                in_specs=[x_spec] + param_specs,
                out_specs=(z_spec, out_spec),
                compiler_params=cparams,
            )(x_p, *flat_params)
            # Skip the post-kernel slice copies when shapes are already aligned.
            z = z_pad if (batch_p == batch and z_p == z_dim) else z_pad[:batch, :z_dim]
            out = out_pad if (batch_p == batch and out_p == out_dim) else out_pad[:batch, :out_dim]
            return z, out

        out_pad = pl.pallas_call(
            kernel,
            out_shape=out_shape_p,
            grid=grid,
            in_specs=[x_spec] + param_specs,
            out_specs=out_spec,
            compiler_params=cparams,
        )(x_p, *flat_params)
        if batch_p == batch and out_p == out_dim:
            return out_pad
        return out_pad[:batch, :out_dim]

    # Pure-JAX reference (same bf16-operand / f32-accumulate math, unpadded).
    def reference(self, x):
        h = x.astype(jnp.bfloat16)
        z = None
        acc = None
        for i, (w, b) in enumerate(self.params_unpadded):
            acc = jnp.dot(h, w, preferred_element_type=jnp.float32) + b
            if self.acts[i] == "relu":
                acc = jnp.maximum(acc, 0.0)
            if i == self.bottleneck_index:
                z = acc
            h = acc.astype(jnp.bfloat16)
        return z, acc


if __name__ == "__main__":
    # Small, deterministic example consistent with an MLP autoencoder forward.
    batch = 8
    input_dim = 256
    encoder_layers = [128, 64]
    encoder_bottleneck = 32
    decoder_layers = [64, 128, 256]  # final layer reconstructs input_dim

    root = jax.random.PRNGKey(0)
    k_param, k_x = jax.random.split(root)

    model = BaselineAutoencoderPallas(
        input_dim, encoder_layers, encoder_bottleneck, decoder_layers, key=k_param,
    )

    x = jax.random.normal(k_x, (batch, input_dim), jnp.float32)

    # forward(input) -> output
    out = jax.block_until_ready(model(x))

    # forward(input, return_z=True) -> (z, output)
    z, out2 = jax.block_until_ready(model(x, return_z=True))

    # Check against pure-JAX reference (same bf16/f32 mixed-precision recipe;
    # kernel outputs are bf16 so compare in f32 with a bf16-level tolerance).
    z_ref, out_ref = model.reference(x)
    assert out.shape == (batch, input_dim)
    assert z.shape == (batch, encoder_bottleneck)
    assert jnp.allclose(out.astype(jnp.float32), out_ref, atol=3e-2, rtol=3e-2)
    assert jnp.allclose(z.astype(jnp.float32), z_ref, atol=3e-2, rtol=3e-2)
    assert jnp.allclose(out.astype(jnp.float32), out2.astype(jnp.float32), atol=1e-5)

    print("KERNEL_OK")
</pallas_src>

<mosaic_0001>
module attributes {stable_mosaic.version = 11 : i64} {
  func.func @kernel(%arg0: i32, %arg1: memref<128x256xbf16, #tpu.memory_space<vmem>>, %arg2: memref<256x128xbf16, #tpu.memory_space<vmem>>, %arg3: memref<1x128xf32, #tpu.memory_space<vmem>>, %arg4: memref<128x128xbf16, #tpu.memory_space<vmem>>, %arg5: memref<1x128xf32, #tpu.memory_space<vmem>>, %arg6: memref<128x128xbf16, #tpu.memory_space<vmem>>, %arg7: memref<1x128xf32, #tpu.memory_space<vmem>>, %arg8: memref<128x128xbf16, #tpu.memory_space<vmem>>, %arg9: memref<1x128xf32, #tpu.memory_space<vmem>>, %arg10: memref<128x128xbf16, #tpu.memory_space<vmem>>, %arg11: memref<1x128xf32, #tpu.memory_space<vmem>>, %arg12: memref<128x256xbf16, #tpu.memory_space<vmem>>, %arg13: memref<1x256xf32, #tpu.memory_space<vmem>>, %arg14: memref<128x256xbf16, #tpu.memory_space<vmem>>) attributes {dimension_semantics = [#tpu.dimension_semantics<parallel>], iteration_bounds = array<i64: 1>, scalar_prefetch = 0 : i64, scratch_operands = 0 : i64, tpu.core_type = #tpu.core_type<tc>, window_params = [{transform_indices = @transform_0, window_bounds = array<i64: 128, 256>}, {pipeline_mode = #tpu.pipeline_mode<synchronous>, transform_indices = @transform_1, window_bounds = array<i64: 256, 128>}, {pipeline_mode = #tpu.pipeline_mode<synchronous>, transform_indices = @transform_2, window_bounds = array<i64: 1, 128>}, {pipeline_mode = #tpu.pipeline_mode<synchronous>, transform_indices = @transform_3, window_bounds = array<i64: 128, 128>}, {pipeline_mode = #tpu.pipeline_mode<synchronous>, transform_indices = @transform_4, window_bounds = array<i64: 1, 128>}, {pipeline_mode = #tpu.pipeline_mode<synchronous>, transform_indices = @transform_5, window_bounds = array<i64: 128, 128>}, {pipeline_mode = #tpu.pipeline_mode<synchronous>, transform_indices = @transform_6, window_bounds = array<i64: 1, 128>}, {pipeline_mode = #tpu.pipeline_mode<synchronous>, transform_indices = @transform_7, window_bounds = array<i64: 128, 128>}, {pipeline_mode = #tpu.pipeline_mode<synchronous>, transform_indices = @transform_8, window_bounds = array<i64: 1, 128>}, {pipeline_mode = #tpu.pipeline_mode<synchronous>, transform_indices = @transform_9, window_bounds = array<i64: 128, 128>}, {pipeline_mode = #tpu.pipeline_mode<synchronous>, transform_indices = @transform_10, window_bounds = array<i64: 1, 128>}, {pipeline_mode = #tpu.pipeline_mode<synchronous>, transform_indices = @transform_11, window_bounds = array<i64: 128, 256>}, {pipeline_mode = #tpu.pipeline_mode<synchronous>, transform_indices = @transform_12, window_bounds = array<i64: 1, 256>}, {transform_indices = @transform_13, window_bounds = array<i64: 128, 256>}]} {
    %c0 = arith.constant 0 : index
    %c0_0 = arith.constant 0 : index
    %0 = vector.load %arg1[%c0, %c0_0] : memref<128x256xbf16, #tpu.memory_space<vmem>>, vector<128x256xbf16>
    %c0_1 = arith.constant 0 : index
    %c0_2 = arith.constant 0 : index
    %1 = vector.load %arg2[%c0_1, %c0_2] : memref<256x128xbf16, #tpu.memory_space<vmem>>, vector<256x128xbf16>
    %c0_3 = arith.constant 0 : index
    %c0_4 = arith.constant 0 : index
    %2 = vector.load %arg3[%c0_3, %c0_4] : memref<1x128xf32, #tpu.memory_space<vmem>>, vector<1x128xf32>
    %cst = arith.constant dense<0.000000e+00> : vector<128x128xf32>
    %3 = tpu.matmul %0, %1, %cst {dimension_numbers = #tpu.dot_dimension_numbers<[1], [0], [0], [1], [0, 0, 1, 1], [], []>} : vector<128x256xbf16>, vector<256x128xbf16>, vector<128x128xf32> -> vector<128x128xf32>
    %4 = vector.broadcast %2 : vector<1x128xf32> to vector<128x128xf32>
    %5 = arith.addf %3, %4 : vector<128x128xf32>
    %cst_5 = arith.constant 0.000000e+00 : f32
    %6 = vector.broadcast %cst_5 : f32 to vector<128x128xf32>
    %7 = arith.maximumf %5, %6 : vector<128x128xf32>
    %8 = arith.truncf %7 : vector<128x128xf32> to vector<128x128xbf16>
    %c0_6 = arith.constant 0 : index
    %c0_7 = arith.constant 0 : index
    %9 = vector.load %arg4[%c0_6, %c0_7] : memref<128x128xbf16, #tpu.memory_space<vmem>>, vector<128x128xbf16>
    %c0_8 = arith.constant 0 : index
    %c0_9 = arith.constant 0 : index
    %10 = vector.load %arg5[%c0_8, %c0_9] : memref<1x128xf32, #tpu.memory_space<vmem>>, vector<1x128xf32>
    %cst_10 = arith.constant dense<0.000000e+00> : vector<128x128xf32>
    %11 = tpu.matmul %8, %9, %cst_10 {dimension_numbers = #tpu.dot_dimension_numbers<[1], [0], [0], [1], [0, 0, 1, 1], [], []>} : vector<128x128xbf16>, vector<128x128xbf16>, vector<128x128xf32> -> vector<128x128xf32>
    %12 = vector.broadcast %10 : vector<1x128xf32> to vector<128x128xf32>
    %13 = arith.addf %11, %12 : vector<128x128xf32>
    %cst_11 = arith.constant 0.000000e+00 : f32
    %14 = vector.broadcast %cst_11 : f32 to vector<128x128xf32>
    %15 = arith.maximumf %13, %14 : vector<128x128xf32>
    %16 = arith.truncf %15 : vector<128x128xf32> to vector<128x128xbf16>
    %c0_12 = arith.constant 0 : index
    %c0_13 = arith.constant 0 : index
    %17 = vector.load %arg6[%c0_12, %c0_13] : memref<128x128xbf16, #tpu.memory_space<vmem>>, vector<128x128xbf16>
    %c0_14 = arith.constant 0 : index
    %c0_15 = arith.constant 0 : index
    %18 = vector.load %arg7[%c0_14, %c0_15] : memref<1x128xf32, #tpu.memory_space<vmem>>, vector<1x128xf32>
    %cst_16 = arith.constant dense<0.000000e+00> : vector<128x128xf32>
    %19 = tpu.matmul %16, %17, %cst_16 {dimension_numbers = #tpu.dot_dimension_numbers<[1], [0], [0], [1], [0, 0, 1, 1], [], []>} : vector<128x128xbf16>, vector<128x128xbf16>, vector<128x128xf32> -> vector<128x128xf32>
    %20 = vector.broadcast %18 : vector<1x128xf32> to vector<128x128xf32>
    %21 = arith.addf %19, %20 : vector<128x128xf32>
    %22 = arith.truncf %21 : vector<128x128xf32> to vector<128x128xbf16>
    %c0_17 = arith.constant 0 : index
    %c0_18 = arith.constant 0 : index
    %23 = vector.load %arg8[%c0_17, %c0_18] : memref<128x128xbf16, #tpu.memory_space<vmem>>, vector<128x128xbf16>
    %c0_19 = arith.constant 0 : index
    %c0_20 = arith.constant 0 : index
    %24 = vector.load %arg9[%c0_19, %c0_20] : memref<1x128xf32, #tpu.memory_space<vmem>>, vector<1x128xf32>
    %cst_21 = arith.constant dense<0.000000e+00> : vector<128x128xf32>
    %25 = tpu.matmul %22, %23, %cst_21 {dimension_numbers = #tpu.dot_dimension_numbers<[1], [0], [0], [1], [0, 0, 1, 1], [], []>} : vector<128x128xbf16>, vector<128x128xbf16>, vector<128x128xf32> -> vector<128x128xf32>
    %26 = vector.broadcast %24 : vector<1x128xf32> to vector<128x128xf32>
    %27 = arith.addf %25, %26 : vector<128x128xf32>
    %cst_22 = arith.constant 0.000000e+00 : f32
    %28 = vector.broadcast %cst_22 : f32 to vector<128x128xf32>
    %29 = arith.maximumf %27, %28 : vector<128x128xf32>
    %30 = arith.truncf %29 : vector<128x128xf32> to vector<128x128xbf16>
    %c0_23 = arith.constant 0 : index
    %c0_24 = arith.constant 0 : index
    %31 = vector.load %arg10[%c0_23, %c0_24] : memref<128x128xbf16, #tpu.memory_space<vmem>>, vector<128x128xbf16>
    %c0_25 = arith.constant 0 : index
    %c0_26 = arith.constant 0 : index
    %32 = vector.load %arg11[%c0_25, %c0_26] : memref<1x128xf32, #tpu.memory_space<vmem>>, vector<1x128xf32>
    %cst_27 = arith.constant dense<0.000000e+00> : vector<128x128xf32>
    %33 = tpu.matmul %30, %31, %cst_27 {dimension_numbers = #tpu.dot_dimension_numbers<[1], [0], [0], [1], [0, 0, 1, 1], [], []>} : vector<128x128xbf16>, vector<128x128xbf16>, vector<128x128xf32> -> vector<128x128xf32>
    %34 = vector.broadcast %32 : vector<1x128xf32> to vector<128x128xf32>
    %35 = arith.addf %33, %34 : vector<128x128xf32>
    %cst_28 = arith.constant 0.000000e+00 : f32
    %36 = vector.broadcast %cst_28 : f32 to vector<128x128xf32>
    %37 = arith.maximumf %35, %36 : vector<128x128xf32>
    %38 = arith.truncf %37 : vector<128x128xf32> to vector<128x128xbf16>
    %c0_29 = arith.constant 0 : index
    %c0_30 = arith.constant 0 : index
    %39 = vector.load %arg12[%c0_29, %c0_30] : memref<128x256xbf16, #tpu.memory_space<vmem>>, vector<128x256xbf16>
    %c0_31 = arith.constant 0 : index
    %c0_32 = arith.constant 0 : index
    %40 = vector.load %arg13[%c0_31, %c0_32] : memref<1x256xf32, #tpu.memory_space<vmem>>, vector<1x256xf32>
    %cst_33 = arith.constant dense<0.000000e+00> : vector<128x256xf32>
    %41 = tpu.matmul %38, %39, %cst_33 {dimension_numbers = #tpu.dot_dimension_numbers<[1], [0], [0], [1], [0, 0, 1, 1], [], []>} : vector<128x128xbf16>, vector<128x256xbf16>, vector<128x256xf32> -> vector<128x256xf32>
    %42 = vector.broadcast %40 : vector<1x256xf32> to vector<128x256xf32>
    %43 = arith.addf %41, %42 : vector<128x256xf32>
    %44 = arith.truncf %43 : vector<128x256xf32> to vector<128x256xbf16>
    %c0_34 = arith.constant 0 : index
    %c0_35 = arith.constant 0 : index
    %45 = vector.load %arg14[%c0_34, %c0_35] : memref<128x256xbf16, #tpu.memory_space<vmem>>, vector<128x256xbf16>
    tpu.vector_store %arg14[%c0_34, %c0_35], %44 {strides = array<i32>} : memref<128x256xbf16, #tpu.memory_space<vmem>>, vector<128x256xbf16>,
    return
  }
  func.func @transform_0(%arg0: i32) -> (i32, i32) {
    %c0_i32 = arith.constant 0 : i32
    %c0_i32_0 = arith.constant 0 : i32
    return %arg0, %c0_i32 : i32, i32
  }
  func.func @transform_1(%arg0: i32) -> (i32, i32) {
    %c0_i32 = arith.constant 0 : i32
    %c0_i32_0 = arith.constant 0 : i32
    %c0_i32_1 = arith.constant 0 : i32
    return %c0_i32, %c0_i32_0 : i32, i32
  }
  func.func @transform_2(%arg0: i32) -> (i32, i32) {
    %c0_i32 = arith.constant 0 : i32
    %c0_i32_0 = arith.constant 0 : i32
    %c0_i32_1 = arith.constant 0 : i32
    return %c0_i32, %c0_i32_0 : i32, i32
  }
  func.func @transform_3(%arg0: i32) -> (i32, i32) {
    %c0_i32 = arith.constant 0 : i32
    %c0_i32_0 = arith.constant 0 : i32
    %c0_i32_1 = arith.constant 0 : i32
    return %c0_i32, %c0_i32_0 : i32, i32
  }
  func.func @transform_4(%arg0: i32) -> (i32, i32) {
    %c0_i32 = arith.constant 0 : i32
    %c0_i32_0 = arith.constant 0 : i32
    %c0_i32_1 = arith.constant 0 : i32
    return %c0_i32, %c0_i32_0 : i32, i32
  }
  func.func @transform_5(%arg0: i32) -> (i32, i32) {
    %c0_i32 = arith.constant 0 : i32
    %c0_i32_0 = arith.constant 0 : i32
    %c0_i32_1 = arith.constant 0 : i32
    return %c0_i32, %c0_i32_0 : i32, i32
  }
  func.func @transform_6(%arg0: i32) -> (i32, i32) {
    %c0_i32 = arith.constant 0 : i32
    %c0_i32_0 = arith.constant 0 : i32
    %c0_i32_1 = arith.constant 0 : i32
    return %c0_i32, %c0_i32_0 : i32, i32
  }
  func.func @transform_7(%arg0: i32) -> (i32, i32) {
    %c0_i32 = arith.constant 0 : i32
    %c0_i32_0 = arith.constant 0 : i32
    %c0_i32_1 = arith.constant 0 : i32
    return %c0_i32, %c0_i32_0 : i32, i32
  }
  func.func @transform_8(%arg0: i32) -> (i32, i32) {
    %c0_i32 = arith.constant 0 : i32
    %c0_i32_0 = arith.constant 0 : i32
    %c0_i32_1 = arith.constant 0 : i32
    return %c0_i32, %c0_i32_0 : i32, i32
  }
  func.func @transform_9(%arg0: i32) -> (i32, i32) {
    %c0_i32 = arith.constant 0 : i32
    %c0_i32_0 = arith.constant 0 : i32
    %c0_i32_1 = arith.constant 0 : i32
    return %c0_i32, %c0_i32_0 : i32, i32
  }
  func.func @transform_10(%arg0: i32) -> (i32, i32) {
    %c0_i32 = arith.constant 0 : i32
    %c0_i32_0 = arith.constant 0 : i32
    %c0_i32_1 = arith.constant 0 : i32
    return %c0_i32, %c0_i32_0 : i32, i32
  }
  func.func @transform_11(%arg0: i32) -> (i32, i32) {
    %c0_i32 = arith.constant 0 : i32
    %c0_i32_0 = arith.constant 0 : i32
    %c0_i32_1 = arith.constant 0 : i32
    return %c0_i32, %c0_i32_0 : i32, i32
  }
  func.func @transform_12(%arg0: i32) -> (i32, i32) {
    %c0_i32 = arith.constant 0 : i32
    %c0_i32_0 = arith.constant 0 : i32
    %c0_i32_1 = arith.constant 0 : i32
    return %c0_i32, %c0_i32_0 : i32, i32
  }
  func.func @transform_13(%arg0: i32) -> (i32, i32) {
    %c0_i32 = arith.constant 0 : i32
    %c0_i32_0 = arith.constant 0 : i32
    return %arg0, %c0_i32 : i32, i32
  }
}

</mosaic_0001>

<bundles_post_ra>
// kernel: a_call__.1
= control target key start
LH: loop header
LB: loop body
LE: loop exit
PB: predicated region body
PF: predicated region fallthrough
CT: control target
= control target key end

     0   :  { %18 = vsyncpa [#allocation3], 0  ;;  %s2014_s25 = smov [#allocation2]   ;;  %s2451_s0 = inlined_call_operand.vmem [shape: bf16[128,256], index: 0, kind: input, shape index: {}]   ;;  %s2452_s1 = inlined_call_operand.vmem [shape: bf16[256,128], index: 1, kind: input, shape index: {}]   ;;  %s2453_s2 = inlined_call_operand.vmem [shape: f32[1,128], index: 2, kind: input, shape index: {}]   ;;  %s2454_s3 = inlined_call_operand.hbm [shape: bf16[128,128], index: 3, kind: input, shape index: {}]   ;;  %s2455_s4 = inlined_call_operand.vmem [shape: f32[1,128], index: 4, kind: input, shape index: {}]   ;;  %s2456_s5 = inlined_call_operand.vmem [shape: bf16[128,128], index: 5, kind: input, shape index: {}]   ;;  %s2457_s6 = inlined_call_operand.vmem [shape: f32[1,128], index: 6, kind: input, shape index: {}]   ;;  %s2458_s7 = inlined_call_operand.vmem [shape: bf16[128,128], index: 7, kind: input, shape index: {}]   ;;  %s2459_s8 = inlined_call_operand.vmem [shape: f32[1,128], index: 8, kind: input, shape index: {}]   ;;  %s2460_s9 = inlined_call_operand.vmem [shape: bf16[128,128], index: 9, kind: input, shape index: {}]   ;;  %s2461_s10 = inlined_call_operand.vmem [shape: f32[1,128], index: 10, kind: input, shape index: {}]   ;;  %s2462_s11 = inlined_call_operand.vmem [shape: bf16[128,256], index: 11, kind: input, shape index: {}]   ;;  %s2463_s12 = inlined_call_operand.vmem [shape: f32[1,256], index: 12, kind: input, shape index: {}]   ;;  %s2464_s13 = inlined_call_operand.vmem [shape: bf16[128,256], index: 13, kind: output, shape index: {}]  }
   0x1   :  { %s30_s26 = sshll.u32 %s2014_s25, 4  ;;  %s1990_s29 = scalar_lea.hbm %s2454_s3, 1024  ;;  %s31_s26 = int_to_ptr.vmem [resolvable:$true] %s30_s26 }
   0x2   :  { %p1991_p0 = scmp.ne.s32.totalorder %s2454_s3, %s1990_s29  ;;  %p1994_p1 = scmp.lt.u32.totalorder %s1990_s29, %s2454_s3 }
   0x4   :  { %p1996_p2 = pnand %p1994_p1, %p1991_p0 }
   0x6   :  { %1999 = shalt.err (!%p1996_p2)
}
   0x7   :  { %s2000_s17 = scalar_lea.vmem %s31_s26, 1024  ;;  %p2005_p4 = scmp.lt.s32.totalorder %s31_s26, %s31_s26 }
   0x8   :  { %p2001_p3 = scmp.ne.s32.totalorder %s31_s26, %s2000_s17  ;;  %p2006_p5 = scmp.lt.s32.totalorder %s2000_s17, %s2000_s17 }
   0xa   :  { %p2007_p6 = por %p2006_p5, %p2005_p4 }
   0xc   :  { %p2008_p7 = pnand %p2007_p6, %p2001_p3 }
   0xe   :  { %2011 = shalt.err (!%p2008_p7)
}
   0xf   :  { %s2015_s18 = smov 64   ;;  %s2016_s19 = smov 4  }
  0x10   :  { %36 = dma.hbm_to_vmem [thread:$0]  %s2454_s3, 1024, %s31_s26, [#allocation3], %s2015_s18, %s2015_s18, %s2016_s19  }
  0x11   :  { %2012 = dma.done.wait [#allocation3], 1024  }
  0x12   :  { %2013 = vsyncadd [#allocation3], 4294966272  ;;  %v1894_v0 = vld [vmem:[%s2452_s1 + $0x40] sm:$0xff]   ;;  %v1896_v2 = vld [vmem:[%s2452_s1 + $0x48] sm:$0xff]  }
  0x13   :  { %v1895_v1 = vld [vmem:[%s2452_s1] sm:$0xff]   ;;  %1618 = vmatprep.subr.bf16.mxu0 %v1894_v0  ;;  %1874 = vmatprep.subr.bf16.mxu1 %v1894_v0  ;;  %v1897_v3 = vld [vmem:[%s2452_s1 + $0x8] sm:$0xff]   ;;  %v1898_v4 = vld [vmem:[%s2452_s1 + $0x50] sm:$0xff]  }
  0x14   :  { %1619 = vmatpush3.bf16.msra.mxu0 %v1895_v1  ;;  %1882 = vmatpush3.bf16.msra.mxu1 %v1895_v1  ;;  %v1899_v5 = vld [vmem:[%s2452_s1 + $0x10] sm:$0xff]   ;;  %v1900_v6 = vld [vmem:[%s2452_s1 + $0x58] sm:$0xff]   ;;  %v1902_v8 = vld [vmem:[%s2452_s1 + $0x60] sm:$0xff]  }
  0x15   :  { %1620 = vmatprep.subr.bf16.mxu0 %v1896_v2  ;;  %1875 = vmatprep.subr.bf16.mxu1 %v1896_v2  ;;  %v1901_v7 = vld [vmem:[%s2452_s1 + $0x18] sm:$0xff]   ;;  %v1903_v9 = vld [vmem:[%s2452_s1 + $0x20] sm:$0xff]   ;;  %v1904_v10 = vld [vmem:[%s2452_s1 + $0x68] sm:$0xff]  }
  0x16   :  { %v1912_v11 = vld [vmem:[%s2451_s0 + $0x4] ss:$8 sps:$4 sm:$0xff]   ;;  %v1906_v13 = vld [vmem:[%s2452_s1 + $0x70] sm:$0xff]   ;;  %v1908_v16 = vld [vmem:[%s2452_s1 + $0x78] sm:$0xff]  }
  0x17   :  { %v1905_v12 = vld [vmem:[%s2452_s1 + $0x28] sm:$0xff]   ;;  %322 = vmatprep.mubr.bf16.mxu0 %v1912_v11  ;;  %v1907_v15 = vld [vmem:[%s2452_s1 + $0x30] sm:$0xff]   ;;  %v1909_v17 = vld [vmem:[%s2452_s1 + $0x38] sm:$0xff]  }
  0x18   :  { %1621 = vmatpush3.bf16.msra.mxu0 %v1897_v3  ;;  %1883 = vmatpush3.bf16.msra.mxu1 %v1897_v3  ;;  %v1920_v14 = vld [vmem:[%s2451_s0 + $0x44] ss:$8 sps:$4 sm:$0xff]   ;;  %v1910_v18 = vld [vmem:[%s2451_s0] ss:$8 sps:$4 sm:$0xff]   ;;  %v1913_v19 = vld [vmem:[%s2451_s0 + $0x14] ss:$8 sps:$4 sm:$0xff]  }
  0x19   :  { %1622 = vmatprep.subr.bf16.mxu0 %v1898_v4  ;;  %1876 = vmatprep.subr.bf16.mxu1 %v1898_v4  ;;  %v1918_v20 = vld [vmem:[%s2451_s0 + $0x40] ss:$8 sps:$4 sm:$0xff]   ;;  %v1924_v22 = vld [vmem:[%s2451_s0 + $0x54] ss:$8 sps:$4 sm:$0xff]   ;;  %v1915_v25 = vld [vmem:[%s2451_s0 + $0x10] ss:$8 sps:$4 sm:$0xff]  }
  0x1a   :  { %354 = vmatprep.mubr.bf16.mxu1 %v1920_v14  ;;  %v1934_v21 = vld [vmem:[#allocation2] sm:$0xff]   ;;  %v1935_v23 = vld [vmem:[#allocation2 + $0x8] sm:$0xff]   ;;  %v1936_v24 = vld [vmem:[#allocation2 + $0x10] sm:$0xff]  }
  0x1b   :  { %v1916_v26 = vld [vmem:[%s2451_s0 + $0x24] ss:$8 sps:$4 sm:$0xff]   ;;  %v1927_v27 = vld [vmem:[%s2451_s0 + $0x50] ss:$8 sps:$4 sm:$0xff]   ;;  %v1921_v30 = vld [vmem:[%s2451_s0 + $0x20] ss:$8 sps:$4 sm:$0xff]  }
  0x1c   :  { %1623 = vmatpush3.bf16.msra.mxu0 %v1899_v5  ;;  %1884 = vmatpush3.bf16.msra.mxu1 %v1899_v5  ;;  %v1928_v28 = vld [vmem:[%s2451_s0 + $0x64] ss:$8 sps:$4 sm:$0xff]   ;;  %v1937_v29 = vld [vmem:[#allocation2 + $0x18] sm:$0xff]   ;;  %v1930_v32 = vld [vmem:[%s2451_s0 + $0x60] ss:$8 sps:$4 sm:$0xff]  }
  0x1d   :  { %1624 = vmatprep.subr.bf16.mxu0 %v1900_v6  ;;  %1877 = vmatprep.subr.bf16.mxu1 %v1900_v6  ;;  %v1922_v31 = vld [vmem:[%s2451_s0 + $0x34] ss:$8 sps:$4 sm:$0xff]   ;;  %v1926_v34 = vld [vmem:[%s2451_s0 + $0x30] ss:$8 sps:$4 sm:$0xff]   ;;  %v1938_v36 = vld [vmem:[#allocation2 + $0x20] sm:$0xff]  }
  0x1e   :  { %v1931_v33 = vld [vmem:[%s2451_s0 + $0x74] ss:$8 sps:$4 sm:$0xff]   ;;  %v1933_v35 = vld [vmem:[%s2451_s0 + $0x70] ss:$8 sps:$4 sm:$0xff]   ;;  %v1939_v37 = vld [vmem:[#allocation2 + $0x28] sm:$0xff]  }
  0x1f   :  { %v1940_v38 = vld [vmem:[#allocation2 + $0x30] sm:$0xff]   ;;  %v1941_v39 = vld [vmem:[#allocation2 + $0x38] sm:$0xff]   ;;  %v2199_v40 = vld [vmem:[%s2456_s5] sm:$0xff]  }
  0x20   :  { %1625 = vmatpush3.bf16.msra.mxu0 %v1901_v7  ;;  %1885 = vmatpush3.bf16.msra.mxu1 %v1901_v7  ;;  %v2205_v42 = vld [vmem:[%s2453_s2] ss:$0 sm:$0xff] }
  0x21   :  { %1626 = vmatprep.subr.bf16.mxu0 %v1902_v8  ;;  %1878 = vmatprep.subr.bf16.mxu1 %v1902_v8 }
  0x24   :  { %1627 = vmatpush3.bf16.msra.mxu0 %v1903_v9  ;;  %1886 = vmatpush3.bf16.msra.mxu1 %v1903_v9 }
  0x25   :  { %1628 = vmatprep.subr.bf16.mxu0 %v1904_v10  ;;  %1879 = vmatprep.subr.bf16.mxu1 %v1904_v10 }
  0x28   :  { %1629 = vmatpush3.bf16.msra.mxu0 %v1905_v12  ;;  %1887 = vmatpush3.bf16.msra.mxu1 %v1905_v12 }
  0x29   :  { %1630 = vmatprep.subr.bf16.mxu0 %v1906_v13  ;;  %1880 = vmatprep.subr.bf16.mxu1 %v1906_v13 }
  0x2c   :  { %1631 = vmatpush3.bf16.msra.mxu0 %v1907_v15  ;;  %1888 = vmatpush3.bf16.msra.mxu1 %v1907_v15 }
  0x2d   :  { %1632 = vmatprep.subr.bf16.mxu0 %v1908_v16  ;;  %1881 = vmatprep.subr.bf16.mxu1 %v1908_v16 }
  0x30   :  { %1633 = vmatpush3.bf16.msra.mxu0 %v1909_v17  ;;  %1889 = vmatpush3.bf16.msra.mxu1 %v1909_v17 }
  0x31   :  { %1746 = vmatprep.subr.bf16.mxu1 %v1934_v21 }
  0x33   :  { %323 = vmatmul.mubr.bf16.vlgmr.msra.gmra.mrb[0].mxu0 %v1910_v18  ;;  %355 = vmatmul.mubr.bf16.vlgmr.msra.gmra.mrb[0].mxu1 %v1918_v20 }
  0x34   :  { %330 = vmatprep.mubr.bf16.mxu0 %v1913_v19  ;;  %362 = vmatprep.mubr.bf16.mxu1 %v1924_v22 }
  0x35   :  { %1747 = vmatpush3.bf16.msra.mxu1 %v1934_v21 }
  0x36   :  { %1748 = vmatprep.subr.bf16.mxu1 %v1935_v23 }
  0x39   :  { %1749 = vmatpush3.bf16.msra.mxu1 %v1935_v23 }
  0x3a   :  { %1750 = vmatprep.subr.bf16.mxu1 %v1936_v24 }
  0x3b   :  { %331 = vmatmul.mubr.bf16.gmra.mrb[4].mxu0 %v1915_v25  ;;  %363 = vmatmul.mubr.bf16.gmra.mrb[4].mxu1 %v1927_v27  ;;  %v1943_v27 = vld [vmem:[%s2456_s5 + $0x8] sm:$0xff]  }
  0x3c   :  { %338 = vmatprep.mubr.bf16.mxu0 %v1916_v26  ;;  %370 = vmatprep.mubr.bf16.mxu1 %v1928_v28 }
  0x3d   :  { %1751 = vmatpush3.bf16.msra.mxu1 %v1936_v24 }
  0x3e   :  { %1752 = vmatprep.subr.bf16.mxu1 %v1937_v29 }
  0x41   :  { %1753 = vmatpush3.bf16.msra.mxu1 %v1937_v29 }
  0x42   :  { %1754 = vmatprep.subr.bf16.mxu1 %v1938_v36 }
  0x43   :  { %339 = vmatmul.mubr.bf16.gmra.mrb[8].mxu0 %v1921_v30  ;;  %371 = vmatmul.mubr.bf16.gmra.mrb[8].mxu1 %v1930_v32 }
  0x44   :  { %346 = vmatprep.mubr.bf16.mxu0 %v1922_v31  ;;  %378 = vmatprep.mubr.bf16.mxu1 %v1931_v33 }
  0x45   :  { %1755 = vmatpush3.bf16.msra.mxu1 %v1938_v36 }
  0x46   :  { %1756 = vmatprep.subr.bf16.mxu1 %v1939_v37 }
  0x49   :  { %1757 = vmatpush3.bf16.msra.mxu1 %v1939_v37 }
  0x4a   :  { %1758 = vmatprep.subr.bf16.mxu1 %v1940_v38 }
  0x4b   :  { %347 = vmatmul.mubr.bf16.gmra.mrb[12].mxu0 %v1926_v34  ;;  %379 = vmatmul.mubr.bf16.gmra.mrb[12].mxu1 %v1933_v35 }
  0x4d   :  { %1759 = vmatpush3.bf16.msra.mxu1 %v1940_v38  ;;  %v1944_v38 = vld [vmem:[%s2456_s5 + $0x10] sm:$0xff]  }
  0x4e   :  { %1760 = vmatprep.subr.bf16.mxu1 %v1941_v39 }
  0x51   :  { %1761 = vmatpush3.bf16.msra.mxu1 %v1941_v39 }
  0x52   :  { %1778 = vmatprep.subr.bf16.mxu1 %v2199_v40 }
 0x106   :  { %v1634_v41 = vpop.f32.mrb[0].mxu0  ;;  %v1658_v44 = vpop.f32.mrb[0].mxu1 }
 0x107   :  { %v1635_v43 = vpop.f32.mrb[1].mxu0  ;;  %v1659_v47 = vpop.f32.mrb[1].mxu1 }
 0x108   :  { %v1636_v45 = vadd.f32 %v1635_v43, %v1634_v41  ;;  %v1637_v46 = vpop.f32.mrb[2].mxu0  ;;  %v1660_v49 = vadd.f32 %v1659_v47, %v1658_v44  ;;  %v1661_v50 = vpop.f32.mrb[2].mxu1 }
 0x109   :  { %v1638_v48 = vpop.f32.mrb[3].mxu0  ;;  %v1662_v53 = vpop.f32.mrb[3].mxu1 }
 0x10a   :  { %v325_v51 = vadd.f32 %v1636_v45, %v2205_v42  ;;  %v1639_v52 = vadd.f32 %v1638_v48, %v1637_v46  ;;  %v357_v54 = vadd.f32 %v1660_v49, %v2205_v42  ;;  %v1663_v55 = vadd.f32 %v1662_v53, %v1661_v50 }
 0x10c   :  { %v328_v56 = vadd.f32 %v1639_v52, %v2205_v42  ;;  %v395_v57 = vmax.f32 %v357_v54, 0.0  ;;  %v360_v58 = vadd.f32 %v1663_v55, %v2205_v42  ;;  %v387_v59 = vmax.f32 %v325_v51, 0.0  ;;  %v1945_v52 = vld [vmem:[%s2456_s5 + $0x18] sm:$0xff]  }
 0x10e   :  { %v388_v60 = vmax.f32 %v328_v56, 0.0  ;;  %v1640_v61 = vpop.f32.mrb[4].mxu0  ;;  %v396_v63 = vmax.f32 %v360_v58, 0.0  ;;  %v1664_v0 = vpop.f32.mrb[4].mxu1 }
 0x10f   :  { %v1641_v62 = vpop.f32.mrb[5].mxu0  ;;  %v1665_v4 = vpop.f32.mrb[5].mxu1 }
 0x110   :  { %v1642_v1 = vadd.f32 %v1641_v62, %v1640_v61  ;;  %v1643_v2 = vpop.f32.mrb[6].mxu0  ;;  %v403_v3 = vpack.c.bf16 %v388_v60, %v387_v59  ;;  %v1666_v6 = vadd.f32 %v1665_v4, %v1664_v0  ;;  %v1667_v7 = vpop.f32.mrb[6].mxu1  ;;  %v2211_v8 = vpack.c.bf16 %v396_v63, %v395_v57  ;;  %v1946_v63 = vld [vmem:[%s2456_s5 + $0x20] sm:$0xff]  }
 0x111   :  { %v1644_v5 = vpop.f32.mrb[7].mxu0  ;;  %v1668_v11 = vpop.f32.mrb[7].mxu1 }
 0x112   :  { %v333_v9 = vadd.f32 %v1642_v1, %v2205_v42  ;;  %v1645_v10 = vadd.f32 %v1644_v5, %v1643_v2  ;;  %1762 = vmatprep.mubr.bf16.mxu1 %v403_v3  ;;  %v365_v12 = vadd.f32 %v1666_v6, %v2205_v42  ;;  %v1669_v13 = vadd.f32 %v1668_v11, %v1667_v7  ;;  %v1947_v6 = vld [vmem:[%s2456_s5 + $0x28] sm:$0xff]   ;;  %v1952_v11 = vld [vmem:[%s2458_s7 + $0x10] sm:$0xff]  }
 0x114   :  { %v336_v14 = vadd.f32 %v1645_v10, %v2205_v42  ;;  %v397_v15 = vmax.f32 %v365_v12, 0.0  ;;  %v368_v16 = vadd.f32 %v1669_v13, %v2205_v42  ;;  %v389_v17 = vmax.f32 %v333_v9, 0.0  ;;  %v1949_v9 = vld [vmem:[%s2456_s5 + $0x38] sm:$0xff]   ;;  %v1951_v10 = vld [vmem:[%s2458_s7 + $0x8] sm:$0xff]   ;;  %v1954_v13 = vld [vmem:[%s2458_s7 + $0x20] sm:$0xff]  }
 0x115   :  { %v1953_v12 = vld [vmem:[%s2458_s7 + $0x18] sm:$0xff]  }
 0x116   :  { %v390_v18 = vmax.f32 %v336_v14, 0.0  ;;  %v1646_v19 = vpop.f32.mrb[8].mxu0  ;;  %v398_v21 = vmax.f32 %v368_v16, 0.0  ;;  %v1670_v22 = vpop.f32.mrb[8].mxu1  ;;  %v1955_v14 = vld [vmem:[%s2458_s7 + $0x28] sm:$0xff]  }
 0x117   :  { %v1647_v20 = vpop.f32.mrb[9].mxu0  ;;  %v1671_v26 = vpop.f32.mrb[9].mxu1 }
 0x118   :  { %v404_v23 = vpack.c.bf16 %v390_v18, %v389_v17  ;;  %v1648_v24 = vadd.f32 %v1647_v20, %v1646_v19  ;;  %v1649_v25 = vpop.f32.mrb[10].mxu0  ;;  %v1672_v29 = vadd.f32 %v1671_v26, %v1670_v22  ;;  %v1673_v30 = vpop.f32.mrb[10].mxu1  ;;  %v408_v31 = vpack.c.bf16 %v398_v21, %v397_v15  ;;  %v1534_v15 = vld [vmem:[%s2455_s4] ss:$0 sm:$0xff] }
 0x119   :  { %v1650_v28 = vpop.f32.mrb[11].mxu0  ;;  %v1674_v34 = vpop.f32.mrb[11].mxu1 }
 0x11a   :  { %v341_v32 = vadd.f32 %v1648_v24, %v2205_v42  ;;  %v1651_v33 = vadd.f32 %v1650_v28, %v1649_v25  ;;  %1763 = vmatmul.mubr.bf16.vlgmr.msra.gmra.mrb[16].mxu1 %v404_v23  ;;  %v373_v35 = vadd.f32 %v1672_v29, %v2205_v42  ;;  %v1675_v36 = vadd.f32 %v1674_v34, %v1673_v30 }
 0x11b   :  { %1779 = vmatpush3.bf16.msra.mxu1 %v2199_v40 }
 0x11c   :  { %v344_v37 = vadd.f32 %v1651_v33, %v2205_v42  ;;  %1780 = vmatprep.subr.bf16.mxu1 %v1943_v27  ;;  %v399_v39 = vmax.f32 %v373_v35, 0.0  ;;  %v376_v41 = vadd.f32 %v1675_v36, %v2205_v42  ;;  %v391_v43 = vmax.f32 %v341_v32, 0.0 }
 0x11e   :  { %v392_v44 = vmax.f32 %v344_v37, 0.0  ;;  %v1652_v45 = vpop.f32.mrb[12].mxu0  ;;  %v400_v47 = vmax.f32 %v376_v41, 0.0  ;;  %v1676_v48 = vpop.f32.mrb[12].mxu1 }
 0x11f   :  { %v1653_v46 = vpop.f32.mrb[13].mxu0  ;;  %1781 = vmatpush3.bf16.msra.mxu1 %v1943_v27  ;;  %v1677_v51 = vpop.f32.mrb[13].mxu1 }
 0x120   :  { %v1654_v49 = vadd.f32 %v1653_v46, %v1652_v45  ;;  %v1655_v50 = vpop.f32.mrb[14].mxu0  ;;  %v405_v40 = vpack.c.bf16 %v392_v44, %v391_v43  ;;  %1782 = vmatprep.subr.bf16.mxu1 %v1944_v38  ;;  %v1678_v54 = vadd.f32 %v1677_v51, %v1676_v48  ;;  %v1679_v55 = vpop.f32.mrb[14].mxu1  ;;  %v409_v56 = vpack.c.bf16 %v400_v47, %v399_v39 }
 0x121   :  { %v1656_v53 = vpop.f32.mrb[15].mxu0  ;;  %v1680_v59 = vpop.f32.mrb[15].mxu1 }
 0x122   :  { %v349_v57 = vadd.f32 %v1654_v49, %v2205_v42  ;;  %v1657_v58 = vadd.f32 %v1656_v53, %v1655_v50  ;;  %1766 = vmatprep.mubr.bf16.mxu1 %v405_v40  ;;  %v381_v60 = vadd.f32 %v1678_v54, %v2205_v42  ;;  %v1681_v61 = vadd.f32 %v1680_v59, %v1679_v55 }
 0x123   :  { %1783 = vmatpush3.bf16.msra.mxu1 %v1944_v38 }
 0x124   :  { %v352_v62 = vadd.f32 %v1657_v58, %v2205_v42  ;;  %1784 = vmatprep.subr.bf16.mxu1 %v1945_v52  ;;  %v401_v0 = vmax.f32 %v381_v60, 0.0  ;;  %v384_v1 = vadd.f32 %v1681_v61, %v2205_v42  ;;  %v393_v2 = vmax.f32 %v349_v57, 0.0  ;;  %v1948_v42 = vld [vmem:[%s2456_s5 + $0x30] sm:$0xff]  }
 0x126   :  { %v394_v3 = vmax.f32 %v352_v62, 0.0  ;;  %v402_v4 = vmax.f32 %v384_v1, 0.0 }
 0x127   :  { %1785 = vmatpush3.bf16.msra.mxu1 %v1945_v52 }
 0x128   :  { %v406_v5 = vpack.c.bf16 %v394_v3, %v393_v2  ;;  %1786 = vmatprep.subr.bf16.mxu1 %v1946_v63  ;;  %v410_v7 = vpack.c.bf16 %v402_v4, %v401_v0 }
 0x12a   :  { %1767 = vmatmul.mubr.bf16.gmra.mrb[20].mxu1 %v406_v5 }
 0x12b   :  { %1770 = vmatprep.mubr.bf16.mxu1 %v2211_v8  ;;  %1787 = vmatpush3.bf16.msra.mxu1 %v1946_v63  ;;  %v1950_v8 = vld [vmem:[%s2458_s7] sm:$0xff]  }
 0x12c   :  { %1788 = vmatprep.subr.bf16.mxu1 %v1947_v6  ;;  %1810 = vmatprep.subr.bf16.mxu0 %v1950_v8 }
 0x12d   :  { %1811 = vmatpush3.bf16.msra.mxu0 %v1950_v8  ;;  %v1957_v8 = vld [vmem:[%s2458_s7 + $0x38] sm:$0xff]  }
 0x12e   :  { %1812 = vmatprep.subr.bf16.mxu0 %v1951_v10 }
 0x12f   :  { %1789 = vmatpush3.bf16.msra.mxu1 %v1947_v6 }
 0x130   :  { %1790 = vmatprep.subr.bf16.mxu1 %v1948_v42 }
 0x131   :  { %1813 = vmatpush3.bf16.msra.mxu0 %v1951_v10  ;;  %v1958_v10 = vld [vmem:[%s2460_s9] sm:$0xff]  }
 0x132   :  { %1771 = vmatmul.mubr.bf16.gmra.mrb[24].mxu1 %v408_v31  ;;  %1814 = vmatprep.subr.bf16.mxu0 %v1952_v11 }
 0x133   :  { %1774 = vmatprep.mubr.bf16.mxu1 %v409_v56  ;;  %1791 = vmatpush3.bf16.msra.mxu1 %v1948_v42 }
 0x134   :  { %1792 = vmatprep.subr.bf16.mxu1 %v1949_v9 }
 0x135   :  { %1815 = vmatpush3.bf16.msra.mxu0 %v1952_v11  ;;  %v1959_v11 = vld [vmem:[%s2460_s9 + $0x8] sm:$0xff]  }
 0x136   :  { %1816 = vmatprep.subr.bf16.mxu0 %v1953_v12 }
 0x137   :  { %1793 = vmatpush3.bf16.msra.mxu1 %v1949_v9  ;;  %v1956_v9 = vld [vmem:[%s2458_s7 + $0x30] sm:$0xff]  }
 0x138   :  { %1842 = vmatprep.subr.bf16.mxu1 %v1958_v10 }
 0x139   :  { %1817 = vmatpush3.bf16.msra.mxu0 %v1953_v12  ;;  %v1960_v12 = vld [vmem:[%s2460_s9 + $0x10] sm:$0xff]  }
 0x13a   :  { %1775 = vmatmul.mubr.bf16.gmra.mrb[28].mxu1 %v410_v7  ;;  %1818 = vmatprep.subr.bf16.mxu0 %v1954_v13 }
 0x13d   :  { %1819 = vmatpush3.bf16.msra.mxu0 %v1954_v13  ;;  %v1961_v13 = vld [vmem:[%s2460_s9 + $0x18] sm:$0xff]  }
 0x13e   :  { %1820 = vmatprep.subr.bf16.mxu0 %v1955_v14 }
 0x141   :  { %1821 = vmatpush3.bf16.msra.mxu0 %v1955_v14  ;;  %v1962_v14 = vld [vmem:[%s2460_s9 + $0x20] sm:$0xff]  }
 0x142   :  { %1822 = vmatprep.subr.bf16.mxu0 %v1956_v9 }
 0x145   :  { %1823 = vmatpush3.bf16.msra.mxu0 %v1956_v9 }
 0x146   :  { %1824 = vmatprep.subr.bf16.mxu0 %v1957_v8 }
 0x149   :  { %1825 = vmatpush3.bf16.msra.mxu0 %v1957_v8 }
 0x1ed   :  { %v1764_v16 = vpop.f32.mrb[16].mxu1 }
 0x1ee   :  { %v525_v17 = vadd.f32 %v1764_v16, %v1534_v15  ;;  %v516_v18 = vpop.f32.mrb[17].mxu1 }
 0x1ef   :  { %v517_v19 = vadd.f32 %v1534_v15, %v516_v18  ;;  %v1765_v20 = vpop.f32.mrb[18].mxu1 }
 0x1f0   :  { %v528_v21 = vadd.f32 %v1765_v20, %v1534_v15  ;;  %v519_v22 = vpop.f32.mrb[19].mxu1  ;;  %v581_v24 = vmax.f32 %v525_v17, 0.0  ;;  %v1543_v17 = vld [vmem:[%s2457_s6] ss:$0 sm:$0xff] }
 0x1f1   :  { %v520_v23 = vadd.f32 %v1534_v15, %v519_v22  ;;  %v579_v26 = vmax.f32 %v517_v19, 0.0 }
 0x1f2   :  { %v582_v25 = vmax.f32 %v528_v21, 0.0 }
 0x1f3   :  { %v580_v27 = vmax.f32 %v520_v23, 0.0 }
 0x1f4   :  { %v596_v28 = vpack.c.bf16 %v582_v25, %v581_v24 }
 0x1f5   :  { %v595_v29 = vpack.c.bf16 %v580_v27, %v579_v26 }
 0x1f7   :  { %1794 = vmatprep.mubr.bf16.mxu1 %v595_v29 }
 0x1f8   :  { %1795 = vmatmul.mubr.bf16.vlgmr.msra.gmra.mrb[32].mxu1 %v596_v28 }
 0x1f9   :  { %1843 = vmatpush3.bf16.msra.mxu1 %v1958_v10 }
 0x1fa   :  { %1844 = vmatprep.subr.bf16.mxu1 %v1959_v11 }
 0x1fd   :  { %v1768_v30 = vpop.f32.mrb[20].mxu1  ;;  %1845 = vmatpush3.bf16.msra.mxu1 %v1959_v11 }
 0x1fe   :  { %v541_v31 = vadd.f32 %v1768_v30, %v1534_v15  ;;  %v532_v32 = vpop.f32.mrb[21].mxu1  ;;  %1846 = vmatprep.subr.bf16.mxu1 %v1960_v12 }
 0x1ff   :  { %v533_v33 = vadd.f32 %v1534_v15, %v532_v32  ;;  %v1769_v34 = vpop.f32.mrb[22].mxu1 }
 0x200   :  { %v544_v35 = vadd.f32 %v1769_v34, %v1534_v15  ;;  %v535_v36 = vpop.f32.mrb[23].mxu1  ;;  %v585_v38 = vmax.f32 %v541_v31, 0.0 }
 0x201   :  { %v536_v37 = vadd.f32 %v1534_v15, %v535_v36  ;;  %v583_v41 = vmax.f32 %v533_v33, 0.0  ;;  %1847 = vmatpush3.bf16.msra.mxu1 %v1960_v12 }
 0x202   :  { %v586_v39 = vmax.f32 %v544_v35, 0.0  ;;  %1848 = vmatprep.subr.bf16.mxu1 %v1961_v13 }
 0x203   :  { %v584_v43 = vmax.f32 %v536_v37, 0.0 }
 0x204   :  { %v598_v44 = vpack.c.bf16 %v586_v39, %v585_v38 }
 0x205   :  { %v597_v45 = vpack.c.bf16 %v584_v43, %v583_v41  ;;  %v1772_v46 = vpop.f32.mrb[24].mxu1  ;;  %1849 = vmatpush3.bf16.msra.mxu1 %v1961_v13 }
 0x206   :  { %v557_v47 = vadd.f32 %v1772_v46, %v1534_v15  ;;  %v548_v48 = vpop.f32.mrb[25].mxu1  ;;  %1850 = vmatprep.subr.bf16.mxu1 %v1962_v14 }
 0x207   :  { %v549_v49 = vadd.f32 %v1534_v15, %v548_v48  ;;  %v1773_v50 = vpop.f32.mrb[26].mxu1  ;;  %1798 = vmatprep.mubr.bf16.mxu1 %v597_v45 }
 0x208   :  { %v589_v40 = vmax.f32 %v557_v47, 0.0  ;;  %v560_v51 = vadd.f32 %v1773_v50, %v1534_v15  ;;  %v551_v52 = vpop.f32.mrb[27].mxu1  ;;  %1799 = vmatmul.mubr.bf16.gmra.mrb[36].mxu1 %v598_v44 }
 0x209   :  { %v587_v53 = vmax.f32 %v549_v49, 0.0  ;;  %v552_v54 = vadd.f32 %v1534_v15, %v551_v52  ;;  %1851 = vmatpush3.bf16.msra.mxu1 %v1962_v14 }
 0x20a   :  { %v590_v55 = vmax.f32 %v560_v51, 0.0 }
 0x20b   :  { %v588_v56 = vmax.f32 %v552_v54, 0.0 }
 0x20c   :  { %v600_v57 = vpack.c.bf16 %v590_v55, %v589_v40 }
 0x20d   :  { %v599_v58 = vpack.c.bf16 %v588_v56, %v587_v53  ;;  %v1776_v59 = vpop.f32.mrb[28].mxu1 }
 0x20e   :  { %v573_v60 = vadd.f32 %v1776_v59, %v1534_v15  ;;  %v564_v61 = vpop.f32.mrb[29].mxu1  ;;  %v1965_v59 = vld [vmem:[%s2460_s9 + $0x38] sm:$0xff]  }
 0x20f   :  { %v565_v62 = vadd.f32 %v1534_v15, %v564_v61  ;;  %v1777_v63 = vpop.f32.mrb[30].mxu1  ;;  %1802 = vmatprep.mubr.bf16.mxu1 %v599_v58  ;;  %v1964_v58 = vld [vmem:[%s2460_s9 + $0x30] sm:$0xff]   ;;  %v1968_v61 = vld [vmem:[%s2462_s11 + $0x4] ss:$8 sps:$4 sm:$0xff]  }
 0x210   :  { %v593_v0 = vmax.f32 %v573_v60, 0.0  ;;  %v576_v1 = vadd.f32 %v1777_v63, %v1534_v15  ;;  %v567_v2 = vpop.f32.mrb[31].mxu1  ;;  %1803 = vmatmul.mubr.bf16.gmra.mrb[40].mxu1 %v600_v57  ;;  %v1966_v60 = vld [vmem:[%s2462_s11] ss:$8 sps:$4 sm:$0xff]   ;;  %1271 = vmatprep.subr.bf16.mxu0 %v1968_v61  ;;  %v1969_v63 = vld [vmem:[%s2462_s11 + $0x10] ss:$8 sps:$4 sm:$0xff]  }
 0x211   :  { %v591_v3 = vmax.f32 %v565_v62, 0.0  ;;  %v568_v4 = vadd.f32 %v1534_v15, %v567_v2  ;;  %v1963_v15 = vld [vmem:[%s2460_s9 + $0x28] sm:$0xff]   ;;  %v1971_v62 = vld [vmem:[%s2462_s11 + $0x14] ss:$8 sps:$4 sm:$0xff]  }
 0x212   :  { %v594_v5 = vmax.f32 %v576_v1, 0.0  ;;  %1852 = vmatprep.subr.bf16.mxu1 %v1963_v15  ;;  %v1972_v1 = vld [vmem:[%s2462_s11 + $0x20] ss:$8 sps:$4 sm:$0xff]   ;;  %v1977_v2 = vld [vmem:[%s2462_s11 + $0x34] ss:$8 sps:$4 sm:$0xff]  }
 0x213   :  { %v592_v6 = vmax.f32 %v568_v4, 0.0  ;;  %1853 = vmatpush3.bf16.msra.mxu1 %v1963_v15  ;;  %v1980_v4 = vld [vmem:[%s2462_s11 + $0x44] ss:$8 sps:$4 sm:$0xff]  }
 0x214   :  { %v602_v7 = vpack.c.bf16 %v594_v5, %v593_v0  ;;  %1854 = vmatprep.subr.bf16.mxu1 %v1964_v58  ;;  %v1974_v0 = vld [vmem:[%s2462_s11 + $0x24] ss:$8 sps:$4 sm:$0xff]   ;;  %v1978_v5 = vld [vmem:[%s2462_s11 + $0x40] ss:$8 sps:$4 sm:$0xff]  }
 0x215   :  { %v601_v42 = vpack.c.bf16 %v592_v6, %v591_v3  ;;  %v1975_v3 = vld [vmem:[%s2462_s11 + $0x30] ss:$8 sps:$4 sm:$0xff]   ;;  %v1983_v6 = vld [vmem:[%s2462_s11 + $0x54] ss:$8 sps:$4 sm:$0xff]  }
 0x217   :  { %1806 = vmatprep.mubr.bf16.mxu1 %v601_v42  ;;  %1855 = vmatpush3.bf16.msra.mxu1 %v1964_v58  ;;  %v1552_v42 = vld [vmem:[%s2459_s8] ss:$0 sm:$0xff] }
 0x218   :  { %1807 = vmatmul.mubr.bf16.gmra.mrb[44].mxu1 %v602_v7  ;;  %1856 = vmatprep.subr.bf16.mxu1 %v1965_v59  ;;  %v1981_v7 = vld [vmem:[%s2462_s11 + $0x50] ss:$8 sps:$4 sm:$0xff]  }
 0x21b   :  { %1857 = vmatpush3.bf16.msra.mxu1 %v1965_v59 }
 0x2cb   :  { %v1796_v16 = vpop.f32.mrb[32].mxu1 }
 0x2cc   :  { %v708_v18 = vpop.f32.mrb[33].mxu1  ;;  %v717_v20 = vadd.f32 %v1796_v16, %v1543_v17 }
 0x2cd   :  { %v1797_v19 = vpop.f32.mrb[34].mxu1  ;;  %v709_v23 = vadd.f32 %v1543_v17, %v708_v18 }
 0x2ce   :  { %v720_v21 = vadd.f32 %v1797_v19, %v1543_v17  ;;  %v711_v22 = vpop.f32.mrb[35].mxu1 }
 0x2cf   :  { %v712_v24 = vadd.f32 %v1543_v17, %v711_v22 }
 0x2d0   :  { %v772_v25 = vpack.c.bf16 %v720_v21, %v717_v20 }
 0x2d1   :  { %v771_v26 = vpack.c.bf16 %v712_v24, %v709_v23 }
 0x2d3   :  { %1826 = vmatprep.mubr.bf16.mxu0 %v771_v26 }
 0x2d4   :  { %1827 = vmatmul.mubr.bf16.vlgmr.msra.gmra.mrb[16].mxu0 %v772_v25 }
 0x2d5   :  { %1272 = vmatpush1.bf16.msra.mxu0 %v1966_v60 }
 0x2d6   :  { %1273 = vmatprep.subr.bf16.mxu0 %v1971_v62 }
 0x2d9   :  { %1274 = vmatpush1.bf16.msra.mxu0 %v1969_v63 }
 0x2da   :  { %1275 = vmatprep.subr.bf16.mxu0 %v1974_v0 }
 0x2db   :  { %v1800_v27 = vpop.f32.mrb[36].mxu1 }
 0x2dc   :  { %v724_v28 = vpop.f32.mrb[37].mxu1  ;;  %v733_v30 = vadd.f32 %v1800_v27, %v1543_v17 }
 0x2dd   :  { %v1801_v29 = vpop.f32.mrb[38].mxu1  ;;  %v725_v33 = vadd.f32 %v1543_v17, %v724_v28  ;;  %1276 = vmatpush1.bf16.msra.mxu0 %v1972_v1  ;;  %v1986_v1 = vld [vmem:[%s2462_s11 + $0x64] ss:$8 sps:$4 sm:$0xff]  }
 0x2de   :  { %v736_v31 = vadd.f32 %v1801_v29, %v1543_v17  ;;  %v727_v32 = vpop.f32.mrb[39].mxu1  ;;  %1277 = vmatprep.subr.bf16.mxu0 %v1977_v2  ;;  %v1984_v2 = vld [vmem:[%s2462_s11 + $0x60] ss:$8 sps:$4 sm:$0xff]  }
 0x2df   :  { %v728_v34 = vadd.f32 %v1543_v17, %v727_v32 }
 0x2e0   :  { %v774_v35 = vpack.c.bf16 %v736_v31, %v733_v30 }
 0x2e1   :  { %v773_v36 = vpack.c.bf16 %v728_v34, %v725_v33  ;;  %1278 = vmatpush1.bf16.msra.mxu0 %v1975_v3  ;;  %v1989_v3 = vld [vmem:[%s2462_s11 + $0x74] ss:$8 sps:$4 sm:$0xff]  }
 0x2e2   :  { %1279 = vmatprep.subr.bf16.mxu0 %v1980_v4  ;;  %v1987_v4 = vld [vmem:[%s2462_s11 + $0x70] ss:$8 sps:$4 sm:$0xff]  }
 0x2e3   :  { %v1804_v37 = vpop.f32.mrb[40].mxu1  ;;  %1830 = vmatprep.mubr.bf16.mxu0 %v773_v36 }
 0x2e4   :  { %v749_v38 = vadd.f32 %v1804_v37, %v1543_v17  ;;  %v740_v39 = vpop.f32.mrb[41].mxu1  ;;  %1831 = vmatmul.mubr.bf16.gmra.mrb[20].mxu0 %v774_v35 }
 0x2e5   :  { %v1805_v41 = vpop.f32.mrb[42].mxu1  ;;  %v741_v45 = vadd.f32 %v1543_v17, %v740_v39  ;;  %1280 = vmatpush1.bf16.msra.mxu0 %v1978_v5  ;;  %v2017_v5 = vmov 0  }
 0x2e6   :  { %v752_v43 = vadd.f32 %v1805_v41, %v1543_v17  ;;  %v743_v44 = vpop.f32.mrb[43].mxu1  ;;  %1281 = vmatprep.subr.bf16.mxu0 %v1983_v6  ;;  %v1561_v6 = vld [vmem:[%s2461_s10] ss:$0 sm:$0xff] }
 0x2e7   :  { %v744_v46 = vadd.f32 %v1543_v17, %v743_v44 }
 0x2e8   :  { %v776_v47 = vpack.c.bf16 %v752_v43, %v749_v38 }
 0x2e9   :  { %v775_v48 = vpack.c.bf16 %v744_v46, %v741_v45  ;;  %1282 = vmatpush1.bf16.msra.mxu0 %v1981_v7 }
 0x2ea   :  { %1283 = vmatprep.subr.bf16.mxu0 %v1986_v1 }
 0x2eb   :  { %v1808_v49 = vpop.f32.mrb[44].mxu1  ;;  %1834 = vmatprep.mubr.bf16.mxu0 %v775_v48 }
 0x2ec   :  { %v765_v50 = vadd.f32 %v1808_v49, %v1543_v17  ;;  %v756_v40 = vpop.f32.mrb[45].mxu1  ;;  %1835 = vmatmul.mubr.bf16.gmra.mrb[24].mxu0 %v776_v47 }
 0x2ed   :  { %v757_v51 = vadd.f32 %v1543_v17, %v756_v40  ;;  %v1809_v52 = vpop.f32.mrb[46].mxu1  ;;  %1284 = vmatpush1.bf16.msra.mxu0 %v1984_v2  ;;  %v1179_v2 = vld [vmem:[%s2463_s12] sm:$0x3] }
 0x2ee   :  { %v768_v53 = vadd.f32 %v1809_v52, %v1543_v17  ;;  %v759_v54 = vpop.f32.mrb[47].mxu1  ;;  %1285 = vmatprep.subr.bf16.mxu0 %v1989_v3 }
 0x2ef   :  { %v760_v55 = vadd.f32 %v1543_v17, %v759_v54 }
 0x2f0   :  { %v778_v56 = vpack.c.bf16 %v768_v53, %v765_v50 }
 0x2f1   :  { %v777_v57 = vpack.c.bf16 %v760_v55, %v757_v51  ;;  %1286 = vmatpush1.bf16.msra.mxu0 %v1987_v4 }
 0x2f3   :  { %1838 = vmatprep.mubr.bf16.mxu0 %v777_v57 }
 0x2f4   :  { %1839 = vmatmul.mubr.bf16.gmra.mrb[28].mxu0 %v778_v56 }
 0x2f5   :  { %1303 = vmatprep.mubr.bf16.mxu0 %v2017_v5 }
 0x3a7   :  { %v1828_v9 = vpop.f32.mrb[16].mxu0 }
 0x3a8   :  { %v893_v8 = vadd.f32 %v1828_v9, %v1552_v42  ;;  %v884_v10 = vpop.f32.mrb[17].mxu0 }
 0x3a9   :  { %v885_v11 = vadd.f32 %v1552_v42, %v884_v10  ;;  %v1829_v12 = vpop.f32.mrb[18].mxu0 }
 0x3aa   :  { %v896_v13 = vadd.f32 %v1829_v12, %v1552_v42  ;;  %v887_v14 = vpop.f32.mrb[19].mxu0  ;;  %v949_v16 = vmax.f32 %v893_v8, 0.0 }
 0x3ab   :  { %v888_v15 = vadd.f32 %v1552_v42, %v887_v14  ;;  %v947_v18 = vmax.f32 %v885_v11, 0.0 }
 0x3ac   :  { %v950_v17 = vmax.f32 %v896_v13, 0.0 }
 0x3ad   :  { %v948_v19 = vmax.f32 %v888_v15, 0.0 }
 0x3ae   :  { %v964_v20 = vpack.c.bf16 %v950_v17, %v949_v16 }
 0x3af   :  { %v963_v21 = vpack.c.bf16 %v948_v19, %v947_v18 }
 0x3b1   :  { %1858 = vmatprep.mubr.bf16.mxu1 %v963_v21 }
 0x3b2   :  { %1859 = vmatmul.mubr.bf16.vlgmr.msra.gmra.mrb[48].mxu1 %v964_v20 }
 0x3b7   :  { %v1832_v22 = vpop.f32.mrb[20].mxu0 }
 0x3b8   :  { %v909_v23 = vadd.f32 %v1832_v22, %v1552_v42  ;;  %v900_v24 = vpop.f32.mrb[21].mxu0 }
 0x3b9   :  { %v901_v25 = vadd.f32 %v1552_v42, %v900_v24  ;;  %v1833_v26 = vpop.f32.mrb[22].mxu0 }
 0x3ba   :  { %v912_v27 = vadd.f32 %v1833_v26, %v1552_v42  ;;  %v903_v28 = vpop.f32.mrb[23].mxu0  ;;  %v953_v30 = vmax.f32 %v909_v23, 0.0 }
 0x3bb   :  { %v904_v29 = vadd.f32 %v1552_v42, %v903_v28  ;;  %v951_v32 = vmax.f32 %v901_v25, 0.0 }
 0x3bc   :  { %v954_v31 = vmax.f32 %v912_v27, 0.0 }
 0x3bd   :  { %v952_v33 = vmax.f32 %v904_v29, 0.0 }
 0x3be   :  { %v966_v34 = vpack.c.bf16 %v954_v31, %v953_v30 }
 0x3bf   :  { %v965_v35 = vpack.c.bf16 %v952_v33, %v951_v32  ;;  %v1836_v36 = vpop.f32.mrb[24].mxu0 }
 0x3c0   :  { %v925_v37 = vadd.f32 %v1836_v36, %v1552_v42  ;;  %v916_v38 = vpop.f32.mrb[25].mxu0 }
 0x3c1   :  { %v917_v39 = vadd.f32 %v1552_v42, %v916_v38  ;;  %v1837_v41 = vpop.f32.mrb[26].mxu0  ;;  %1862 = vmatprep.mubr.bf16.mxu1 %v965_v35 }
 0x3c2   :  { %v928_v43 = vadd.f32 %v1837_v41, %v1552_v42  ;;  %v919_v44 = vpop.f32.mrb[27].mxu0  ;;  %1863 = vmatmul.mubr.bf16.gmra.mrb[52].mxu1 %v966_v34  ;;  %v957_v46 = vmax.f32 %v925_v37, 0.0 }
 0x3c3   :  { %v920_v45 = vadd.f32 %v1552_v42, %v919_v44  ;;  %v955_v48 = vmax.f32 %v917_v39, 0.0 }
 0x3c4   :  { %v958_v47 = vmax.f32 %v928_v43, 0.0 }
 0x3c5   :  { %v956_v49 = vmax.f32 %v920_v45, 0.0 }
 0x3c6   :  { %v968_v50 = vpack.c.bf16 %v958_v47, %v957_v46 }
 0x3c7   :  { %v967_v40 = vpack.c.bf16 %v956_v49, %v955_v48  ;;  %v1840_v51 = vpop.f32.mrb[28].mxu0 }
 0x3c8   :  { %v941_v52 = vadd.f32 %v1840_v51, %v1552_v42  ;;  %v932_v53 = vpop.f32.mrb[29].mxu0 }
 0x3c9   :  { %v933_v54 = vadd.f32 %v1552_v42, %v932_v53  ;;  %v1841_v55 = vpop.f32.mrb[30].mxu0  ;;  %1866 = vmatprep.mubr.bf16.mxu1 %v967_v40 }
 0x3ca   :  { %v961_v56 = vmax.f32 %v941_v52, 0.0  ;;  %v944_v57 = vadd.f32 %v1841_v55, %v1552_v42  ;;  %v935_v58 = vpop.f32.mrb[31].mxu0  ;;  %1867 = vmatmul.mubr.bf16.gmra.mrb[56].mxu1 %v968_v50 }
 0x3cb   :  { %v959_v59 = vmax.f32 %v933_v54, 0.0  ;;  %v936_v60 = vadd.f32 %v1552_v42, %v935_v58 }
 0x3cc   :  { %v962_v61 = vmax.f32 %v944_v57, 0.0 }
 0x3cd   :  { %v960_v62 = vmax.f32 %v936_v60, 0.0 }
 0x3ce   :  { %v970_v63 = vpack.c.bf16 %v962_v61, %v961_v56 }
 0x3cf   :  { %v969_v0 = vpack.c.bf16 %v960_v62, %v959_v59 }
 0x3d1   :  { %1870 = vmatprep.mubr.bf16.mxu1 %v969_v0 }
 0x3d2   :  { %1871 = vmatmul.mubr.bf16.gmra.mrb[60].mxu1 %v970_v63  ;;  %v1181_v63 = vlaneseq }
 0x3d4   :  { %v1182_v0 = vshrl.u32 %v1181_v63, 7 }
 0x3d6   :  { %v1183_v1 = vsub.s32 0, %v1182_v0  ;;  %v1187_v3 = vsub.s32 1, %v1182_v0 }
 0x3d8   :  { %v2367_v4 = vrot.slane %v1179_v2, %v1183_v1 }
 0x485   :  { %v1860_v7 = vpop.f32.mrb[48].mxu1 }
 0x486   :  { %v1085_v42 = vadd.f32 %v1860_v7, %v1561_v6  ;;  %v1076_v9 = vpop.f32.mrb[49].mxu1 }
 0x487   :  { %v1077_v8 = vadd.f32 %v1561_v6, %v1076_v9  ;;  %v1861_v10 = vpop.f32.mrb[50].mxu1 }
 0x488   :  { %v1088_v11 = vadd.f32 %v1861_v10, %v1561_v6  ;;  %v1079_v12 = vpop.f32.mrb[51].mxu1  ;;  %v1141_v14 = vmax.f32 %v1085_v42, 0.0 }
 0x489   :  { %v1080_v13 = vadd.f32 %v1561_v6, %v1079_v12  ;;  %v1139_v16 = vmax.f32 %v1077_v8, 0.0 }
 0x48a   :  { %v1142_v15 = vmax.f32 %v1088_v11, 0.0 }
 0x48b   :  { %v1140_v17 = vmax.f32 %v1080_v13, 0.0 }
 0x48c   :  { %v1156_v18 = vpack.c.bf16 %v1142_v15, %v1141_v14 }
 0x48d   :  { %v1155_v19 = vpack.c.bf16 %v1140_v17, %v1139_v16 }
 0x48f   :  { %1304 = vmatmul.mubr.bf16.vlgmr.msra.gmra.mrb[32].mxu0 %v1155_v19 }
 0x490   :  { %1313 = vmatprep.mubr.bf16.mxu0 %v2017_v5 }
 0x495   :  { %v1864_v20 = vpop.f32.mrb[52].mxu1 }
 0x496   :  { %v1101_v21 = vadd.f32 %v1864_v20, %v1561_v6  ;;  %v1092_v22 = vpop.f32.mrb[53].mxu1 }
 0x497   :  { %v1093_v23 = vadd.f32 %v1561_v6, %v1092_v22  ;;  %v1865_v24 = vpop.f32.mrb[54].mxu1  ;;  %1314 = vmatmul.mubr.bf16.gmra.mrb[36].mxu0 %v1156_v18 }
 0x498   :  { %v1104_v25 = vadd.f32 %v1865_v24, %v1561_v6  ;;  %v1095_v26 = vpop.f32.mrb[55].mxu1  ;;  %1323 = vmatprep.mubr.bf16.mxu0 %v2017_v5  ;;  %v1145_v28 = vmax.f32 %v1101_v21, 0.0 }
 0x499   :  { %v1096_v27 = vadd.f32 %v1561_v6, %v1095_v26  ;;  %v1143_v30 = vmax.f32 %v1093_v23, 0.0 }
 0x49a   :  { %v1146_v29 = vmax.f32 %v1104_v25, 0.0 }
 0x49b   :  { %v1144_v31 = vmax.f32 %v1096_v27, 0.0 }
 0x49c   :  { %v1158_v32 = vpack.c.bf16 %v1146_v29, %v1145_v28 }
 0x49d   :  { %v1157_v33 = vpack.c.bf16 %v1144_v31, %v1143_v30  ;;  %v1868_v34 = vpop.f32.mrb[56].mxu1 }
 0x49e   :  { %v1117_v35 = vadd.f32 %v1868_v34, %v1561_v6  ;;  %v1108_v36 = vpop.f32.mrb[57].mxu1 }
 0x49f   :  { %v1109_v37 = vadd.f32 %v1561_v6, %v1108_v36  ;;  %v1869_v38 = vpop.f32.mrb[58].mxu1  ;;  %1324 = vmatmul.mubr.bf16.gmra.mrb[40].mxu0 %v1157_v33 }
 0x4a0   :  { %v1120_v39 = vadd.f32 %v1869_v38, %v1561_v6  ;;  %v1111_v41 = vpop.f32.mrb[59].mxu1  ;;  %1333 = vmatprep.mubr.bf16.mxu0 %v2017_v5  ;;  %v1149_v44 = vmax.f32 %v1117_v35, 0.0 }
 0x4a1   :  { %v1112_v43 = vadd.f32 %v1561_v6, %v1111_v41  ;;  %v1147_v46 = vmax.f32 %v1109_v37, 0.0 }
 0x4a2   :  { %v1150_v45 = vmax.f32 %v1120_v39, 0.0 }
 0x4a3   :  { %v1148_v47 = vmax.f32 %v1112_v43, 0.0 }
 0x4a4   :  { %v1160_v48 = vpack.c.bf16 %v1150_v45, %v1149_v44 }
 0x4a5   :  { %v1159_v49 = vpack.c.bf16 %v1148_v47, %v1147_v46  ;;  %v1872_v50 = vpop.f32.mrb[60].mxu1 }
 0x4a6   :  { %v1133_v40 = vadd.f32 %v1872_v50, %v1561_v6  ;;  %v1124_v51 = vpop.f32.mrb[61].mxu1 }
 0x4a7   :  { %v1125_v52 = vadd.f32 %v1561_v6, %v1124_v51  ;;  %v1873_v53 = vpop.f32.mrb[62].mxu1  ;;  %1334 = vmatmul.mubr.bf16.gmra.mrb[44].mxu0 %v1158_v32 }
 0x4a8   :  { %v1153_v54 = vmax.f32 %v1133_v40, 0.0  ;;  %v1136_v55 = vadd.f32 %v1873_v53, %v1561_v6  ;;  %v1127_v56 = vpop.f32.mrb[63].mxu1  ;;  %1343 = vmatprep.mubr.bf16.mxu0 %v2017_v5 }
 0x4a9   :  { %v1128_v57 = vadd.f32 %v1561_v6, %v1127_v56  ;;  %v1151_v59 = vmax.f32 %v1125_v52, 0.0  ;;  %v2369_v6 = vrot.slane %v1179_v2, %v1187_v3 }
 0x4aa   :  { %v1154_v58 = vmax.f32 %v1136_v55, 0.0 }
 0x4ab   :  { %v1152_v60 = vmax.f32 %v1128_v57, 0.0 }
 0x4ac   :  { %v1162_v61 = vpack.c.bf16 %v1154_v58, %v1153_v54 }
 0x4ad   :  { %v1161_v62 = vpack.c.bf16 %v1152_v60, %v1151_v59 }
 0x4af   :  { %1344 = vmatmul.mubr.bf16.gmra.mrb[48].mxu0 %v1159_v49 }
 0x4b0   :  { %1353 = vmatprep.mubr.bf16.mxu0 %v2017_v5 }
 0x4b7   :  { %1354 = vmatmul.mubr.bf16.gmra.mrb[52].mxu0 %v1160_v48 }
 0x4b8   :  { %1363 = vmatprep.mubr.bf16.mxu0 %v2017_v5 }
 0x4bf   :  { %1364 = vmatmul.mubr.bf16.gmra.mrb[56].mxu0 %v1161_v62 }
 0x4c0   :  { %1373 = vmatprep.mubr.bf16.mxu0 %v2017_v5 }
 0x4c7   :  { %1374 = vmatmul.mubr.bf16.gmra.mrb[60].mxu0 %v1162_v61 }
 0x562   :  { %v1305_v7 = vpop.f32.mrb[32].mxu0 }
 0x563   :  { %v1306_v42 = vadd.f32 %v1305_v7, %v2367_v4  ;;  %v1307_v9 = vpop.f32.mrb[33].mxu0 }
 0x564   :  { %v1308_v8 = vadd.f32 %v1307_v9, %v2369_v6  ;;  %v1309_v5 = vpop.f32.mrb[34].mxu0 }
 0x565   :  { %v1310_v10 = vadd.f32 %v1309_v5, %v2367_v4  ;;  %v1311_v11 = vpop.f32.mrb[35].mxu0 }
 0x566   :  { %v1602_v12 = vpack.c.bf16 %v1308_v8, %v1306_v42  ;;  %v1312_v13 = vadd.f32 %v1311_v11, %v2369_v6 }
 0x568   :  { %1480 = vst [vmem:[%s2464_s13] sm:$0xff] %v1602_v12  ;;  %v1603_v14 = vpack.c.bf16 %v1312_v13, %v1310_v10 }
 0x56a   :  { %1481 = vst [vmem:[%s2464_s13 + $0x8] sm:$0xff] %v1603_v14  ;;  %v1315_v15 = vpop.f32.mrb[36].mxu0 }
 0x56b   :  { %v1316_v16 = vadd.f32 %v1315_v15, %v2367_v4  ;;  %v1317_v17 = vpop.f32.mrb[37].mxu0 }
 0x56c   :  { %v1318_v18 = vadd.f32 %v1317_v17, %v2369_v6  ;;  %v1319_v19 = vpop.f32.mrb[38].mxu0 }
 0x56d   :  { %v1320_v20 = vadd.f32 %v1319_v19, %v2367_v4  ;;  %v1321_v21 = vpop.f32.mrb[39].mxu0 }
 0x56e   :  { %v1604_v22 = vpack.c.bf16 %v1318_v18, %v1316_v16  ;;  %v1322_v23 = vadd.f32 %v1321_v21, %v2369_v6 }
 0x570   :  { %1482 = vst [vmem:[%s2464_s13 + $0x10] sm:$0xff] %v1604_v22  ;;  %v1605_v24 = vpack.c.bf16 %v1322_v23, %v1320_v20 }
 0x572   :  { %1483 = vst [vmem:[%s2464_s13 + $0x18] sm:$0xff] %v1605_v24  ;;  %v1325_v25 = vpop.f32.mrb[40].mxu0 }
 0x573   :  { %v1326_v26 = vadd.f32 %v1325_v25, %v2367_v4  ;;  %v1327_v27 = vpop.f32.mrb[41].mxu0 }
 0x574   :  { %v1328_v28 = vadd.f32 %v1327_v27, %v2369_v6  ;;  %v1329_v29 = vpop.f32.mrb[42].mxu0 }
 0x575   :  { %v1330_v30 = vadd.f32 %v1329_v29, %v2367_v4  ;;  %v1331_v31 = vpop.f32.mrb[43].mxu0 }
 0x576   :  { %v1606_v32 = vpack.c.bf16 %v1328_v28, %v1326_v26  ;;  %v1332_v33 = vadd.f32 %v1331_v31, %v2369_v6 }
 0x578   :  { %1484 = vst [vmem:[%s2464_s13 + $0x20] sm:$0xff] %v1606_v32  ;;  %v1607_v34 = vpack.c.bf16 %v1332_v33, %v1330_v30 }
 0x57a   :  { %1485 = vst [vmem:[%s2464_s13 + $0x28] sm:$0xff] %v1607_v34  ;;  %v1335_v35 = vpop.f32.mrb[44].mxu0 }
 0x57b   :  { %v1336_v36 = vadd.f32 %v1335_v35, %v2367_v4  ;;  %v1337_v37 = vpop.f32.mrb[45].mxu0 }
 0x57c   :  { %v1338_v38 = vadd.f32 %v1337_v37, %v2369_v6  ;;  %v1339_v39 = vpop.f32.mrb[46].mxu0 }
 0x57d   :  { %v1340_v41 = vadd.f32 %v1339_v39, %v2367_v4  ;;  %v1341_v43 = vpop.f32.mrb[47].mxu0 }
 0x57e   :  { %v1608_v44 = vpack.c.bf16 %v1338_v38, %v1336_v36  ;;  %v1342_v45 = vadd.f32 %v1341_v43, %v2369_v6 }
 0x580   :  { %1486 = vst [vmem:[%s2464_s13 + $0x30] sm:$0xff] %v1608_v44  ;;  %v1609_v46 = vpack.c.bf16 %v1342_v45, %v1340_v41 }
 0x582   :  { %1487 = vst [vmem:[%s2464_s13 + $0x38] sm:$0xff] %v1609_v46  ;;  %v1345_v47 = vpop.f32.mrb[48].mxu0 }
 0x583   :  { %v1346_v48 = vadd.f32 %v1345_v47, %v2367_v4  ;;  %v1347_v49 = vpop.f32.mrb[49].mxu0 }
 0x584   :  { %v1348_v50 = vadd.f32 %v1347_v49, %v2369_v6  ;;  %v1349_v40 = vpop.f32.mrb[50].mxu0 }
 0x585   :  { %v1350_v51 = vadd.f32 %v1349_v40, %v2367_v4  ;;  %v1351_v52 = vpop.f32.mrb[51].mxu0 }
 0x586   :  { %v1610_v53 = vpack.c.bf16 %v1348_v50, %v1346_v48  ;;  %v1352_v54 = vadd.f32 %v1351_v52, %v2369_v6 }
 0x588   :  { %1488 = vst [vmem:[%s2464_s13 + $0x40] sm:$0xff] %v1610_v53  ;;  %v1611_v55 = vpack.c.bf16 %v1352_v54, %v1350_v51 }
 0x58a   :  { %1489 = vst [vmem:[%s2464_s13 + $0x48] sm:$0xff] %v1611_v55  ;;  %v1355_v56 = vpop.f32.mrb[52].mxu0 }
 0x58b   :  { %v1356_v57 = vadd.f32 %v1355_v56, %v2367_v4  ;;  %v1357_v58 = vpop.f32.mrb[53].mxu0 }
 0x58c   :  { %v1358_v59 = vadd.f32 %v1357_v58, %v2369_v6  ;;  %v1359_v60 = vpop.f32.mrb[54].mxu0 }
 0x58d   :  { %v1360_v61 = vadd.f32 %v1359_v60, %v2367_v4  ;;  %v1361_v62 = vpop.f32.mrb[55].mxu0 }
 0x58e   :  { %v1612_v63 = vpack.c.bf16 %v1358_v59, %v1356_v57  ;;  %v1362_v0 = vadd.f32 %v1361_v62, %v2369_v6 }
 0x590   :  { %1490 = vst [vmem:[%s2464_s13 + $0x50] sm:$0xff] %v1612_v63  ;;  %v1613_v1 = vpack.c.bf16 %v1362_v0, %v1360_v61 }
 0x592   :  { %1491 = vst [vmem:[%s2464_s13 + $0x58] sm:$0xff] %v1613_v1  ;;  %v1365_v2 = vpop.f32.mrb[56].mxu0 }
 0x593   :  { %v1366_v3 = vadd.f32 %v1365_v2, %v2367_v4  ;;  %v1367_v7 = vpop.f32.mrb[57].mxu0 }
 0x594   :  { %v1368_v42 = vadd.f32 %v1367_v7, %v2369_v6  ;;  %v1369_v9 = vpop.f32.mrb[58].mxu0 }
 0x595   :  { %v1370_v8 = vadd.f32 %v1369_v9, %v2367_v4  ;;  %v1371_v5 = vpop.f32.mrb[59].mxu0 }
 0x596   :  { %v1614_v10 = vpack.c.bf16 %v1368_v42, %v1366_v3  ;;  %v1372_v11 = vadd.f32 %v1371_v5, %v2369_v6 }
 0x598   :  { %1492 = vst [vmem:[%s2464_s13 + $0x60] sm:$0xff] %v1614_v10  ;;  %v1615_v12 = vpack.c.bf16 %v1372_v11, %v1370_v8 }
 0x59a   :  { %1493 = vst [vmem:[%s2464_s13 + $0x68] sm:$0xff] %v1615_v12  ;;  %v1375_v13 = vpop.f32.mrb[60].mxu0 }
 0x59b   :  { %v1376_v14 = vadd.f32 %v1375_v13, %v2367_v4  ;;  %v1377_v15 = vpop.f32.mrb[61].mxu0 }
 0x59c   :  { %v1378_v16 = vadd.f32 %v1377_v15, %v2369_v6  ;;  %v1379_v17 = vpop.f32.mrb[62].mxu0 }
 0x59d   :  { %v1380_v18 = vadd.f32 %v1379_v17, %v2367_v4  ;;  %v1381_v19 = vpop.f32.mrb[63].mxu0 }
 0x59e   :  { %v1616_v20 = vpack.c.bf16 %v1378_v16, %v1376_v14  ;;  %v1382_v21 = vadd.f32 %v1381_v19, %v2369_v6 }
 0x5a0   :  { %1494 = vst [vmem:[%s2464_s13 + $0x70] sm:$0xff] %v1616_v20  ;;  %v1617_v22 = vpack.c.bf16 %v1382_v21, %v1380_v18 }
 0x5a2   :  { %1495 = vst [vmem:[%s2464_s13 + $0x78] sm:$0xff] %v1617_v22 }
 0x5a3   :  { %1500 = vsyncpa [#allocation3], 1 }

</bundles_post_ra>
